<compile_context>
chip_gen: v7x
topology: tpu7x:2x2x1
jax: 0.10.0
libtpu: 0.0.40
codegen_flags: <defaults>
</compile_context>

<pallas_src>
import functools

import jax
import jax.numpy as jnp
from jax.experimental import pallas as pl
from jax.experimental.pallas import tpu as pltpu


def _cdiv(a, b):
    return -(-a // b)


def _pow_static(x, p):
    """x**p for x > 0 with static p.  Integer/half-integer p -> VPU mul/sqrt only."""
    if p == 1.0:
        return x
    two_p = 2.0 * float(p)
    if two_p == int(two_p) and 0.5 <= p <= 16.0:
        n = int(two_p)                  # x**p == x**(n/2)
        k, h = divmod(n, 2)             # integer part, half flag
        out = None
        base, e = x, k
        while e > 0:                    # exponentiation by squaring (plain VPU muls)
            if e & 1:
                out = base if out is None else out * base
            e >>= 1
            if e:
                base = base * base
        if h:
            r = jnp.sqrt(x)
            out = r if out is None else out * r
        return out
    # Generic exponent: 2 transcendentals / element on the EUP.
    return jnp.exp(p * jnp.log(x))


def _gem_kernel(x_ref, o_ref, acc_ref, *, p, inv_p, eps, inv_hw, hw, block_hw,
                need_mask):
    # x_ref: (TR, THW) block, o_ref: (TR, 1), acc_ref: (TR, 1) f32 partial sums.
    k = pl.program_id(1)

    @pl.when(k == 0)
    def _init():
        acc_ref[...] = jnp.zeros_like(acc_ref)

    x = x_ref[...]
    if x.dtype == jnp.bfloat16:
        # bf16 VALU path (v6e/v7x): clamp + pow in bf16, f32 accumulation below.
        xc = jnp.maximum(x, eps)
    else:
        xc = jnp.maximum(x.astype(jnp.float32), eps)
    xp = _pow_static(xc, p)

    if need_mask:
        # Last HW block overhangs the array: zero out the padding lanes.
        lane = jax.lax.broadcasted_iota(jnp.int32, xp.shape, 1) + k * block_hw
        xp = jnp.where(lane < hw, xp, 0.0)

    # Lane-axis reduction on the otherwise idle MXU: (TR,THW) @ (THW,1) -> (TR,1),
    # f32 accumulate.  Keeps the per-element add off the VPU.
    ones = jnp.ones((xp.shape[1], 1), xp.dtype)
    acc_ref[...] += jnp.dot(xp, ones, preferred_element_type=jnp.float32)

    @pl.when(k == pl.num_programs(1) - 1)
    def _finalize():
        m = acc_ref[...] * inv_hw                     # mean over H*W
        if p == 1.0:
            r = m
        elif p == 2.0:
            r = jnp.sqrt(m)
        elif p == 4.0:
            r = jnp.sqrt(jnp.sqrt(m))
        else:
            r = jnp.exp(inv_p * jnp.log(m))           # tiny (TR elems), cost negligible
        o_ref[...] = r.astype(o_ref.dtype)


def _default_budget():
    """Per-block VMEM budget (bytes).  Small so double-buffering pipelines & fits
    the default scoped-VMEM limit; generation-aware cap for smaller-VMEM chips."""
    budget = 2 * 1024 * 1024
    try:
        cap = pltpu.get_tpu_info().vmem_capacity_bytes
        budget = min(budget, max(256 * 1024, cap // 16))
    except Exception:
        pass
    return budget


def _pick_tiles(n_rows, hw, itemsize, budget_bytes, target_steps=16,
                min_block_bytes=512 * 1024):
    """Choose (row_tile, hw_tile) for the (n_rows, hw) -> (n_rows, 1) reduction."""
    sub = max(8, 32 // itemsize)               # sublane multiple: 8 f32 / 16 bf16
    hw_pad = _cdiv(hw, 128) * 128              # lane-padded row width actually in VMEM

    row_cap = budget_bytes // (hw_pad * itemsize)
    if row_cap >= sub:
        # Whole HW fits in one block: tile rows only, single HW step.
        max_tr = max(sub, min((row_cap // sub) * sub, _cdiv(n_rows, sub) * sub))
        total_bytes = _cdiv(n_rows, sub) * sub * hw_pad * itemsize
        # Don't shred tiny problems into sub-min_block_bytes steps.
        eff_target = max(1, min(target_steps, _cdiv(total_bytes, min_block_bytes)))
        best, best_score = sub, None
        for tr in range(sub, max_tr + 1, sub):
            steps = _cdiv(n_rows, tr)
            score = (steps % 2 == 0 or steps == 1,   # even split across v7x's 2 TCs
                     min(steps, eff_target),         # enough steps to pipeline/balance
                     -steps)                         # then biggest blocks
            if best_score is None or score > best_score:
                best, best_score = tr, score
        return best, hw
    # HW too large for one block even with a single sublane group of rows:
    # tile the reduction (lane) axis as well.
    tr = sub
    thw = max(128, (budget_bytes // (tr * itemsize)) // 128 * 128)
    if thw >= hw:
        thw = hw
    return tr, thw


def gem_pool(x_nchw, p=3.0, eps=1e-6, *, block_budget_bytes=None):
    """GeM pooling: x (B, C, H, W) -> (B, C, 1, 1)."""
    B, C, H, W = x_nchw.shape
    HW = H * W
    R = B * C
    x2 = x_nchw.reshape(R, HW)                 # contiguous, free reshape
    itemsize = x2.dtype.itemsize

    budget = _default_budget() if block_budget_bytes is None else block_budget_bytes
    TR, THW = _pick_tiles(R, HW, itemsize, budget)
    n_r = _cdiv(R, TR)
    n_hw = _cdiv(HW, THW)
    need_mask = (THW < HW) and (HW % THW != 0)

    p = float(p)
    eps = float(eps)
    two_p = 2.0 * p
    generic_p = not (two_p == int(two_p) and 0.5 <= p <= 16.0)

    kernel = functools.partial(
        _gem_kernel, p=p, inv_p=1.0 / p, eps=eps, inv_hw=1.0 / float(HW),
        hw=HW, block_hw=THW, need_mask=need_mask)

    out = pl.pallas_call(
        kernel,
        out_shape=jax.ShapeDtypeStruct((R, 1), x_nchw.dtype),
        grid_spec=pltpu.PrefetchScalarGridSpec(
            num_scalar_prefetch=0,
            grid=(n_r, n_hw),                               # reduction axis last
            in_specs=[pl.BlockSpec((TR, THW), lambda r, k: (r, k))],
            out_specs=pl.BlockSpec((TR, 1), lambda r, k: (r, 0)),
            scratch_shapes=[pltpu.VMEM((TR, 1), jnp.float32)],
        ),
        compiler_params=pltpu.CompilerParams(
            dimension_semantics=("parallel", "arbitrary")),
        cost_estimate=pl.CostEstimate(
            flops=4 * R * HW,
            transcendentals=(2 * R * HW if generic_p else 2 * R),
            bytes_accessed=R * HW * itemsize + R * itemsize),
    )(x2)

    return out.reshape(B, C, 1, 1)


def gem_ref(x, p=3.0, eps=1e-6):
    # Pure-JAX reference matching the PyTorch forward.
    xc = jnp.maximum(x.astype(jnp.float32), eps)
    pooled = jnp.mean(xc ** p, axis=(2, 3), keepdims=True)
    return (pooled ** (1.0 / p)).astype(x.dtype)


if __name__ == "__main__":
    def check(x, p, tol, **kw):
        out = jax.block_until_ready(gem_pool(x, p=p, **kw))
        ref = gem_ref(x, p=p)
        assert out.shape == ref.shape, (out.shape, ref.shape)
        ok = jnp.allclose(out.astype(jnp.float32), ref.astype(jnp.float32),
                          atol=tol, rtol=tol)
        assert ok, f"mismatch vs reference (p={p}, shape={x.shape}, dtype={x.dtype})"

    # 1) Primary small shape (B=2, C=4, 16x16), default p=3 fast path.
    x1 = jax.random.normal(jax.random.PRNGKey(0), (2, 4, 16, 16), jnp.float32)
    check(x1, 3.0, 1e-4)

    # 2) Non-128-aligned HW (7x7) + half-integer and generic exponents.
    x2 = jax.random.normal(jax.random.PRNGKey(1), (2, 32, 7, 7), jnp.float32)
    check(x2, 3.0, 1e-4)
    check(x2, 2.5, 1e-4)      # half-integer p -> muls + sqrt on the VPU
    check(x2, 2.7, 1e-4)      # truly generic p -> exp/log on the EUP

    # 3) Non-divisible R (row padding dropped on writeback).
    x3 = jax.random.normal(jax.random.PRNGKey(2), (3, 5, 12, 12), jnp.float32)
    check(x3, 3.0, 1e-4)

    # 4) Force the HW reduction grid axis + overhang mask with a tiny block budget.
    x4 = jax.random.normal(jax.random.PRNGKey(3), (1, 16, 24, 24), jnp.float32)
    check(x4, 3.0, 1e-4, block_budget_bytes=16 * 1024)

    # 5) bf16 elementwise path (bf16 clamp/cube, f32 MXU accumulate).
    x5 = jax.random.normal(jax.random.PRNGKey(4), (2, 16, 16, 16), jnp.bfloat16)
    check(x5, 3.0, 3e-2)

    print("KERNEL_OK")
</pallas_src>

<mosaic_0001>
module attributes {stable_mosaic.version = 11 : i64} {
  func.func @_gem_kernel(%arg0: i32, %arg1: i32, %arg2: memref<8x256xf32, #tpu.memory_space<vmem>>, %arg3: memref<8x1xf32, #tpu.memory_space<vmem>>, %arg4: memref<8x1xf32, #tpu.memory_space<vmem>>) attributes {dimension_semantics = [#tpu.dimension_semantics<parallel>, #tpu.dimension_semantics<arbitrary>], iteration_bounds = array<i64: 1, 1>, scalar_prefetch = 0 : i64, scratch_operands = 1 : i64, tpu.core_type = #tpu.core_type<tc>, window_params = [{transform_indices = @transform_0, window_bounds = array<i64: 8, 256>}, {transform_indices = @transform_1, window_bounds = array<i64: 8, 1>}]} {
    %c0_i32 = arith.constant 0 : i32
    %0 = arith.cmpi eq, %arg1, %c0_i32 : i32
    %1 = arith.extui %0 : i1 to i32
    %c0_i32_0 = arith.constant 0 : i32
    %2 = arith.cmpi ne, %1, %c0_i32_0 : i32
    scf.if %2 {
      %cst_10 = arith.constant 0.000000e+00 : f32
      %16 = vector.broadcast %cst_10 : f32 to vector<8x1xf32>
      %c0_11 = arith.constant 0 : index
      %c0_12 = arith.constant 0 : index
      %17 = vector.load %arg4[%c0_11, %c0_12] : memref<8x1xf32, #tpu.memory_space<vmem>>, vector<8x1xf32>
      tpu.vector_store %arg4[%c0_11, %c0_12], %16 {strides = array<i32>} : memref<8x1xf32, #tpu.memory_space<vmem>>, vector<8x1xf32>,
    } else {
    }
    %c0 = arith.constant 0 : index
    %c0_1 = arith.constant 0 : index
    %3 = vector.load %arg2[%c0, %c0_1] : memref<8x256xf32, #tpu.memory_space<vmem>>, vector<8x256xf32>
    %cst = arith.constant 9.99999997E-7 : f32
    %4 = vector.broadcast %cst : f32 to vector<8x256xf32>
    %5 = arith.maximumf %3, %4 : vector<8x256xf32>
    %6 = arith.mulf %5, %5 : vector<8x256xf32>
    %7 = arith.mulf %5, %6 : vector<8x256xf32>
    %cst_2 = arith.constant 1.000000e+00 : f32
    %8 = vector.broadcast %cst_2 : f32 to vector<256x1xf32>
    %c0_3 = arith.constant 0 : index
    %c0_4 = arith.constant 0 : index
    %9 = vector.load %arg4[%c0_3, %c0_4] : memref<8x1xf32, #tpu.memory_space<vmem>>, vector<8x1xf32>
    %cst_5 = arith.constant dense<0.000000e+00> : vector<8x1xf32>
    %10 = tpu.matmul %7, %8, %cst_5 {dimension_numbers = #tpu.dot_dimension_numbers<[1], [0], [0], [1], [0, 0, 1, 1], [], []>} : vector<8x256xf32>, vector<256x1xf32>, vector<8x1xf32> -> vector<8x1xf32>
    %11 = arith.addf %9, %10 : vector<8x1xf32>
    %c0_6 = arith.constant 0 : index
    %c0_7 = arith.constant 0 : index
    %12 = vector.load %arg4[%c0_6, %c0_7] : memref<8x1xf32, #tpu.memory_space<vmem>>, vector<8x1xf32>
    tpu.vector_store %arg4[%c0_6, %c0_7], %11 {strides = array<i32>} : memref<8x1xf32, #tpu.memory_space<vmem>>, vector<8x1xf32>,
    %c0_i32_8 = arith.constant 0 : i32
    %13 = arith.cmpi eq, %arg1, %c0_i32_8 : i32
    %14 = arith.extui %13 : i1 to i32
    %c0_i32_9 = arith.constant 0 : i32
    %15 = arith.cmpi ne, %14, %c0_i32_9 : i32
    scf.if %15 {
      %c0_10 = arith.constant 0 : index
      %c0_11 = arith.constant 0 : index
      %16 = vector.load %arg4[%c0_10, %c0_11] : memref<8x1xf32, #tpu.memory_space<vmem>>, vector<8x1xf32>
      %cst_12 = arith.constant 3.906250e-03 : f32
      %17 = vector.broadcast %cst_12 : f32 to vector<8x1xf32>
      %18 = arith.mulf %16, %17 : vector<8x1xf32>
      %19 = math.log %18 : vector<8x1xf32>
      %cst_13 = arith.constant 0.333333343 : f32
      %20 = vector.broadcast %cst_13 : f32 to vector<8x1xf32>
      %21 = arith.mulf %20, %19 : vector<8x1xf32>
      %22 = math.exp %21 : vector<8x1xf32>
      %c0_14 = arith.constant 0 : index
      %c0_15 = arith.constant 0 : index
      %23 = vector.load %arg3[%c0_14, %c0_15] : memref<8x1xf32, #tpu.memory_space<vmem>>, vector<8x1xf32>
      tpu.vector_store %arg3[%c0_14, %c0_15], %22 {strides = array<i32>} : memref<8x1xf32, #tpu.memory_space<vmem>>, vector<8x1xf32>,
    } else {
    }
    return
  }
  func.func @transform_0(%arg0: i32, %arg1: i32) -> (i32, i32) {
    %c0_i32 = arith.constant 0 : i32
    return %arg0, %arg1 : i32, i32
  }
  func.func @transform_1(%arg0: i32, %arg1: i32) -> (i32, i32) {
    %c0_i32 = arith.constant 0 : i32
    %c0_i32_0 = arith.constant 0 : i32
    return %arg0, %c0_i32 : i32, i32
  }
}

</mosaic_0001>

<bundles_post_ra>
// kernel: tpu_custom_call.1
= control target key start
LH: loop header
LB: loop body
LE: loop exit
PB: predicated region body
PF: predicated region fallthrough
CT: control target
= control target key end

     0   :  { %6 = vsyncpa [#allocation4], 0  ;;  %s206_s6 = smov [#allocation3]   ;;  %s237_s0 = inlined_call_operand.hbm [shape: f32[8,256], index: 0, kind: input, shape index: {}]   ;;  %s238_s1 = inlined_call_operand.vmem [shape: f32[8,1], index: 1, kind: output, shape index: {}]  }
   0x1   :  { %s13_s7 = sshll.u32 %s206_s6, 4  ;;  %s182_s10 = scalar_lea.hbm %s237_s0, 256  ;;  %s14_s7 = int_to_ptr.vmem [resolvable:$true] %s13_s7 }
   0x2   :  { %p183_p0 = scmp.ne.s32.totalorder %s237_s0, %s182_s10  ;;  %p186_p1 = scmp.lt.u32.totalorder %s182_s10, %s237_s0 }
   0x4   :  { %p188_p2 = pnand %p186_p1, %p183_p0 }
   0x6   :  { %191 = shalt.err (!%p188_p2)
}
   0x7   :  { %s192_s15 = scalar_lea.vmem %s14_s7, 256  ;;  %p197_p4 = scmp.lt.s32.totalorder %s14_s7, %s14_s7 }
   0x8   :  { %p193_p3 = scmp.ne.s32.totalorder %s14_s7, %s192_s15  ;;  %p198_p5 = scmp.lt.s32.totalorder %s192_s15, %s192_s15 }
   0xa   :  { %p199_p6 = por %p198_p5, %p197_p4 }
   0xc   :  { %p200_p7 = pnand %p199_p6, %p193_p3 }
   0xe   :  { %203 = shalt.err (!%p200_p7)
}
   0xf   :  { %16 = dma.hbm_to_vmem [thread:$0]  %s237_s0, 256, %s14_s7, [#allocation4]  }
  0x10   :  { %204 = dma.done.wait [#allocation4], 256  }
  0x11   :  { %205 = vsyncadd [#allocation4], 4294967040  ;;  %vm24_vm0 = vcmask 7168   ;;  %v207_v0 = vmov 1.0|1.0   ;;  %v208_v1 = vmov 0.0  }
  0x12   :  { %159 = vmatprep.subr.bf16.mxu0 %v207_v0  ;;  %25 = vst.msk [vmem:[#allocation2] sm:$0xff] %vm24_vm0, %v208_v1  ;;  %v27_v2 = vld [vmem:[#allocation3 + $0x8] sm:$0xff]  ;;  %v26_v6 = vld [vmem:[#allocation3] sm:$0xff] }
  0x13   :  { %160 = vmatpush3.bf16.msra.mxu0 %v207_v0  ;;  %v29_v3 = vmax.f32 %v27_v2, 1e-06  ;;  %v28_v7 = vmax.f32 %v26_v6, 1e-06 }
  0x14   :  { %161 = vmatprep.subr.bf16.mxu0 %v207_v0 }
  0x15   :  { %v31_v4 = vmul.f32 %v29_v3, %v29_v3  ;;  %v30_v8 = vmul.f32 %v28_v7, %v28_v7 }
  0x17   :  { %162 = vmatpush3.bf16.msra.mxu0 %v207_v0  ;;  %v33_v5 = vmul.f32 %v31_v4, %v29_v3  ;;  %v32_v9 = vmul.f32 %v30_v8, %v28_v7 }
  0x18   :  { %163 = vmatprep.subr.bf16.mxu0 %v207_v0 }
  0x19   :  { %99 = vmatprep.mubr.f32.mxu0 %v33_v5  ;;  %v34_v11 = vld [vmem:[#allocation2] sm:$0xff] }
  0x1b   :  { %164 = vmatpush3.bf16.msra.mxu0 %v207_v0 }
  0x1c   :  { %165 = vmatprep.subr.bf16.mxu0 %v207_v0 }
  0x1f   :  { %166 = vmatpush3.bf16.msra.mxu0 %v207_v0 }
  0x20   :  { %167 = vmatprep.subr.bf16.mxu0 %v207_v0 }
  0x23   :  { %168 = vmatpush3.bf16.msra.mxu0 %v207_v0 }
  0x24   :  { %169 = vmatprep.subr.bf16.mxu0 %v207_v0 }
  0x27   :  { %170 = vmatpush3.bf16.msra.mxu0 %v207_v0 }
  0x28   :  { %171 = vmatprep.subr.bf16.mxu0 %v207_v0 }
  0x2b   :  { %172 = vmatpush3.bf16.msra.mxu0 %v207_v0 }
  0x2c   :  { %173 = vmatprep.subr.bf16.mxu0 %v207_v0 }
  0x2f   :  { %174 = vmatpush3.bf16.msra.mxu0 %v207_v0 }
  0x32   :  { %100 = vmatmul.mubr.f32.vlgmr.msra.gmra.mrb[0].mxu0 %v32_v9 }
 0x105   :  { %v156_v10 = vpop.f32.mrb[0].mxu0 }
 0x106   :  { %v157_v12 = vpop.f32.mrb[1].mxu0 }
 0x107   :  { %v158_v13 = vadd.f32 %v157_v12, %v156_v10 }
 0x109   :  { %v105_v14 = vadd.f32 %v158_v13, %v34_v11 }
 0x10b   :  { %107 = vst.msk [vmem:[#allocation2] sm:$0xff] %vm24_vm0, %v105_v14 }
 0x112   :  { %v111_v15 = vld [vmem:[#allocation2] sm:$0xff] }
 0x113   :  { %v112_v16 = vmul.f32 0.00390625, %v111_v15 }
 0x115   :  { %178 = vlog2.f32 %v112_v16 }
 0x11f   :  { %v179_v17 = vpop.eup %178 }
 0x120   :  { %v114_v18 = vmul.f32 0.6931472, %v179_v17 }
 0x122   :  { %v115_v19 = vmul.f32 0.33333334, %v114_v18 }
 0x124   :  { %v116_v20 = vmul.f32 1.442695, %v115_v19 }
 0x126   :  { %180 = vpow2.f32 %v116_v20 }
 0x130   :  { %v181_v21 = vpop.eup %180 }
 0x131   :  { %118 = vst.msk [vmem:[%s238_s1] sm:$0xff] %vm24_vm0, %v181_v21 }
 0x132   :  { %123 = vsyncpa [#allocation4], 1 }

</bundles_post_ra>
